<compile_context>
chip_gen: v6e
topology: v6e:2x2x1
jax: 0.10.0
libtpu: 0.0.40
codegen_flags: <defaults>
</compile_context>

<pallas_src>
import numpy as np
import jax
import jax.numpy as jnp
from jax import lax
from jax.experimental import pallas as pl
from jax.experimental.pallas import tpu as pltpu

# ---------------- configuration ----------------------------------------------
# The module hard-codes groups=32 in layer2 and intermediate_ch = out_ch // 4,
# so out_ch must be a multiple of 128; with downsample_rate=1 the residual add
# additionally forces in_ch == out_ch.  Smallest consistent config:
B = 2
IN_CH = 128
OUT_CH = 128
CMID = OUT_CH // 4       # 32
GROUPS = 32              # == CMID  ->  layer2 is depthwise
H = 8
W = 8
L = B * H * W            # 128 total lanes
TILE_L = 128             # lane tile (full vreg lane width); multiple of H*W
EPS = 1e-5

assert TILE_L % (H * W) == 0, "lane tile must hold whole images (mask validity)"
assert L % TILE_L == 0
assert IN_CH == TILE_L, "w1 rides in the lane-dense slab only when IN_CH == TILE_L"
assert CMID % 8 == 0 and OUT_CH % 8 == 0

# Packed-parameter slab row offsets (all rows are lane-dense, width TILE_L):
#   [W1_OFF  : W1_OFF+CMID)      layer1 1x1 weight, BN1 scale folded
#   [TAP_OFF : TAP_OFF+9*CMID)   depthwise taps (tap-major), BN2 scale folded,
#                                border/batch-seam mask pre-multiplied per lane
#   [B1_OFF  : B1_OFF+CMID)      BN1 shift, broadcast along lanes
#   [B2_OFF  : B2_OFF+CMID)      BN2 shift, broadcast along lanes
#   [B3_OFF  : B3_OFF+OUT_CH)    BN3 shift, broadcast along lanes
W1_OFF = 0
TAP_OFF = CMID
B1_OFF = TAP_OFF + 9 * CMID
B2_OFF = B1_OFF + CMID
B3_OFF = B2_OFF + CMID
P_ROWS = B3_OFF + OUT_CH                      # 512

# (tap index, lane-roll shift) for the 8 non-centre taps.
_TAP_SHIFTS = []
for _di in (-1, 0, 1):
    for _dj in (-1, 0, 1):
        _t = (_di + 1) * 3 + (_dj + 1)
        if _t == 4:
            continue
        _TAP_SHIFTS.append((_t, (-(_di * W + _dj)) % TILE_L))


# ---------------- Pallas kernel ----------------------------------------------
def resnext_block_kernel(x_ref, p_ref, w3_ref, o_ref):
    # layer1: 1x1 conv (BN1 folded) + bias + ReLU (MXU + VPU).
    h = jnp.dot(p_ref[W1_OFF:W1_OFF + CMID, :], x_ref[...],
                preferred_element_type=jnp.float32)             # (CMID, TILE_L)
    h = jnp.maximum(h + p_ref[B1_OFF:B1_OFF + CMID, :], 0.0)

    # layer2: 3x3 grouped conv with groups == CMID (depthwise), padding=1.
    # Shifted taps come from lane rolls (XLU slot); the static border and
    # batch-seam masks are already baked into the per-lane tap weights, so the
    # loop body is roll + mul + add only.
    acc = h * p_ref[TAP_OFF + 4 * CMID:TAP_OFF + 5 * CMID, :]   # centre tap
    for t, shift in _TAP_SHIFTS:
        acc = acc + (pltpu.roll(h, shift, axis=1) *
                     p_ref[TAP_OFF + t * CMID:TAP_OFF + (t + 1) * CMID, :])
    h = jnp.maximum(acc + p_ref[B2_OFF:B2_OFF + CMID, :], 0.0)

    # layer3: 1x1 conv (BN3 folded) + bias, then residual add + ReLU.
    h = jnp.dot(w3_ref[...], h, preferred_element_type=jnp.float32)  # (OUT_CH, TILE_L)
    o_ref[...] = jnp.maximum(
        h + p_ref[B3_OFF:B3_OFF + OUT_CH, :] + x_ref[...], 0.0)


def resnext_block_pallas(x, kparams):
    """x: (B, IN_CH, H, W) NCHW.  kparams: (lane-dense param slab, w3 folded)."""
    params, w3f = kparams
    # Wrapper-side layout plumbing: (B, C, H, W) -> lane-dense (C, B*H*W).
    x_flat = jnp.transpose(x, (1, 0, 2, 3)).reshape(IN_CH, L)
    n_tiles = L // TILE_L

    out_flat = pl.pallas_call(
        resnext_block_kernel,
        out_shape=jax.ShapeDtypeStruct((OUT_CH, L), jnp.float32),
        grid_spec=pltpu.PrefetchScalarGridSpec(
            num_scalar_prefetch=0,
            grid=(n_tiles,),                       # lane-tiled; 1 step here
            in_specs=[
                pl.BlockSpec((IN_CH, TILE_L), lambda i: (0, i)),
                pl.BlockSpec((P_ROWS, TILE_L), lambda i: (0, 0)),
                pl.BlockSpec((OUT_CH, CMID), lambda i: (0, 0)),
            ],
            out_specs=pl.BlockSpec((OUT_CH, TILE_L), lambda i: (0, i)),
        ),
        compiler_params=pltpu.CompilerParams(
            dimension_semantics=("parallel",)),
    )(x_flat, params, w3f)

    return jnp.transpose(out_flat.reshape(OUT_CH, B, H, W), (1, 0, 2, 3))


# ---------------- parameter construction (glue, plain JAX) -------------------
def bn_fold(gamma, beta, mean, var):
    scale = gamma / jnp.sqrt(var + EPS)
    shift = beta - mean * scale
    return scale, shift


def init_bn(key, c):
    k1, k2, k3, k4 = jax.random.split(key, 4)
    gamma = jax.random.uniform(k1, (c,), minval=0.5, maxval=1.5)
    beta = jax.random.normal(k2, (c,)) * 0.1
    mean = jax.random.normal(k3, (c,)) * 0.1
    var = jax.random.uniform(k4, (c,), minval=0.5, maxval=1.5)
    return gamma, beta, mean, var


def pack_params(P):
    """Fold BN into the conv weights/biases; pack lane-dense slab + w3."""
    s1, b1 = bn_fold(*P['bn1'])
    s2, b2 = bn_fold(*P['bn2'])
    s3, b3 = bn_fold(*P['bn3'])

    w1f = s1[:, None] * P['w1'][:, :, 0, 0]                     # (CMID, IN_CH)
    w3f = s3[:, None] * P['w3'][:, :, 0, 0]                     # (OUT_CH, CMID)

    # Pre-masked per-lane depthwise taps.  The mask is compile-time constant
    # (depends only on H, W, di, dj) and periodic with H*W, so it tiles over
    # the batch and over lane tiles.
    lane = jnp.arange(TILE_L)
    row = (lane % (H * W)) // W
    col = lane % W
    w2 = P['w2'][:, 0]                                           # (CMID, 3, 3)
    taps = []
    for di in (-1, 0, 1):
        for dj in (-1, 0, 1):
            valid = ((row + di >= 0) & (row + di < H) &
                     (col + dj >= 0) & (col + dj < W)).astype(jnp.float32)
            taps.append((s2 * w2[:, di + 1, dj + 1])[:, None] * valid[None, :])
    taps = jnp.concatenate(taps, axis=0)                         # (9*CMID, TILE_L)

    ones = jnp.ones((1, TILE_L), jnp.float32)
    params = jnp.concatenate([
        w1f,                                                     # [W1_OFF ...)
        taps,                                                    # [TAP_OFF ...)
        b1[:, None] * ones,                                      # [B1_OFF ...)
        b2[:, None] * ones,                                      # [B2_OFF ...)
        b3[:, None] * ones,                                      # [B3_OFF ...)
    ], axis=0).astype(jnp.float32)
    assert params.shape == (P_ROWS, TILE_L)

    return params, jnp.asarray(w3f, jnp.float32)


# ---------------- pure-JAX reference (semantics of the PyTorch module) -------
def conv1x1_ref(x, w):
    return lax.conv_general_dilated(
        x, w, (1, 1), [(0, 0), (0, 0)],
        dimension_numbers=('NCHW', 'OIHW', 'NCHW'))


def conv3x3_grouped_ref(x, w, groups):
    return lax.conv_general_dilated(
        x, w, (1, 1), [(1, 1), (1, 1)],
        dimension_numbers=('NCHW', 'OIHW', 'NCHW'),
        feature_group_count=groups)


def bn_apply_ref(x, bn):
    gamma, beta, mean, var = bn
    scale = gamma / jnp.sqrt(var + EPS)
    shift = beta - mean * scale
    return x * scale[None, :, None, None] + shift[None, :, None, None]


def ref_forward(x, P):
    h = jax.nn.relu(bn_apply_ref(conv1x1_ref(x, P['w1']), P['bn1']))
    h = jax.nn.relu(bn_apply_ref(conv3x3_grouped_ref(h, P['w2'], GROUPS),
                                 P['bn2']))
    h = bn_apply_ref(conv1x1_ref(h, P['w3']), P['bn3'])
    return jax.nn.relu(h + x)


# ---------------- main --------------------------------------------------------
if __name__ == "__main__":
    key = jax.random.PRNGKey(0)
    keys = jax.random.split(key, 8)

    x = jax.random.normal(keys[0], (B, IN_CH, H, W), jnp.float32)

    P = {
        'w1': jax.random.normal(keys[1], (CMID, IN_CH, 1, 1), jnp.float32) * 0.1,
        'w2': jax.random.normal(keys[2], (CMID, CMID // GROUPS, 3, 3),
                                jnp.float32) * 0.2,
        'w3': jax.random.normal(keys[3], (OUT_CH, CMID, 1, 1), jnp.float32) * 0.1,
        'bn1': init_bn(keys[4], CMID),
        'bn2': init_bn(keys[5], CMID),
        'bn3': init_bn(keys[6], OUT_CH),
    }

    kparams = pack_params(P)

    out = jax.block_until_ready(resnext_block_pallas(x, kparams))
    ref = jax.block_until_ready(ref_forward(x, P))

    np.testing.assert_allclose(np.asarray(out), np.asarray(ref),
                               rtol=1e-3, atol=1e-3)

    print("KERNEL_OK")
</pallas_src>

<mosaic_0001>
module attributes {stable_mosaic.version = 11 : i64} {
  func.func @resnext_block_kernel(%arg0: i32, %arg1: memref<128x128xf32, #tpu.memory_space<vmem>>, %arg2: memref<512x128xf32, #tpu.memory_space<vmem>>, %arg3: memref<128x32xf32, #tpu.memory_space<vmem>>, %arg4: memref<128x128xf32, #tpu.memory_space<vmem>>) attributes {dimension_semantics = [#tpu.dimension_semantics<parallel>], iteration_bounds = array<i64: 1>, scalar_prefetch = 0 : i64, scratch_operands = 0 : i64, tpu.core_type = #tpu.core_type<tc>, window_params = [{transform_indices = @transform_0, window_bounds = array<i64: 128, 128>}, {pipeline_mode = #tpu.pipeline_mode<synchronous>, transform_indices = @transform_1, window_bounds = array<i64: 512, 128>}, {pipeline_mode = #tpu.pipeline_mode<synchronous>, transform_indices = @transform_2, window_bounds = array<i64: 128, 32>}, {transform_indices = @transform_3, window_bounds = array<i64: 128, 128>}]} {
    %c0 = arith.constant 0 : index
    %c0_0 = arith.constant 0 : index
    %0 = vector.load %arg2[%c0, %c0_0] : memref<512x128xf32, #tpu.memory_space<vmem>>, vector<32x128xf32>
    %c0_1 = arith.constant 0 : index
    %c0_2 = arith.constant 0 : index
    %1 = vector.load %arg1[%c0_1, %c0_2] : memref<128x128xf32, #tpu.memory_space<vmem>>, vector<128x128xf32>
    %cst = arith.constant dense<0.000000e+00> : vector<32x128xf32>
    %2 = tpu.matmul %0, %1, %cst {dimension_numbers = #tpu.dot_dimension_numbers<[1], [0], [0], [1], [0, 0, 1, 1], [], []>} : vector<32x128xf32>, vector<128x128xf32>, vector<32x128xf32> -> vector<32x128xf32>
    %c320 = arith.constant 320 : index
    %c0_3 = arith.constant 0 : index
    %3 = vector.load %arg2[%c320, %c0_3] : memref<512x128xf32, #tpu.memory_space<vmem>>, vector<32x128xf32>
    %4 = arith.addf %2, %3 : vector<32x128xf32>
    %cst_4 = arith.constant 0.000000e+00 : f32
    %5 = vector.broadcast %cst_4 : f32 to vector<32x128xf32>
    %6 = arith.maximumf %4, %5 : vector<32x128xf32>
    %c160 = arith.constant 160 : index
    %c0_5 = arith.constant 0 : index
    %7 = vector.load %arg2[%c160, %c0_5] : memref<512x128xf32, #tpu.memory_space<vmem>>, vector<32x128xf32>
    %8 = arith.mulf %6, %7 : vector<32x128xf32>
    %c9_i32 = arith.constant 9 : i32
    %9 = tpu.dynamic_rotate %6 by %c9_i32 dim 1 : vector<32x128xf32>, i32 -> vector<32x128xf32>
    %c32 = arith.constant 32 : index
    %c0_6 = arith.constant 0 : index
    %10 = vector.load %arg2[%c32, %c0_6] : memref<512x128xf32, #tpu.memory_space<vmem>>, vector<32x128xf32>
    %11 = arith.mulf %9, %10 : vector<32x128xf32>
    %12 = arith.addf %8, %11 : vector<32x128xf32>
    %c8_i32 = arith.constant 8 : i32
    %13 = tpu.dynamic_rotate %6 by %c8_i32 dim 1 : vector<32x128xf32>, i32 -> vector<32x128xf32>
    %c64 = arith.constant 64 : index
    %c0_7 = arith.constant 0 : index
    %14 = vector.load %arg2[%c64, %c0_7] : memref<512x128xf32, #tpu.memory_space<vmem>>, vector<32x128xf32>
    %15 = arith.mulf %13, %14 : vector<32x128xf32>
    %16 = arith.addf %12, %15 : vector<32x128xf32>
    %c7_i32 = arith.constant 7 : i32
    %17 = tpu.dynamic_rotate %6 by %c7_i32 dim 1 : vector<32x128xf32>, i32 -> vector<32x128xf32>
    %c96 = arith.constant 96 : index
    %c0_8 = arith.constant 0 : index
    %18 = vector.load %arg2[%c96, %c0_8] : memref<512x128xf32, #tpu.memory_space<vmem>>, vector<32x128xf32>
    %19 = arith.mulf %17, %18 : vector<32x128xf32>
    %20 = arith.addf %16, %19 : vector<32x128xf32>
    %c1_i32 = arith.constant 1 : i32
    %21 = tpu.dynamic_rotate %6 by %c1_i32 dim 1 : vector<32x128xf32>, i32 -> vector<32x128xf32>
    %c128 = arith.constant 128 : index
    %c0_9 = arith.constant 0 : index
    %22 = vector.load %arg2[%c128, %c0_9] : memref<512x128xf32, #tpu.memory_space<vmem>>, vector<32x128xf32>
    %23 = arith.mulf %21, %22 : vector<32x128xf32>
    %24 = arith.addf %20, %23 : vector<32x128xf32>
    %c127_i32 = arith.constant 127 : i32
    %25 = tpu.dynamic_rotate %6 by %c127_i32 dim 1 : vector<32x128xf32>, i32 -> vector<32x128xf32>
    %c192 = arith.constant 192 : index
    %c0_10 = arith.constant 0 : index
    %26 = vector.load %arg2[%c192, %c0_10] : memref<512x128xf32, #tpu.memory_space<vmem>>, vector<32x128xf32>
    %27 = arith.mulf %25, %26 : vector<32x128xf32>
    %28 = arith.addf %24, %27 : vector<32x128xf32>
    %c121_i32 = arith.constant 121 : i32
    %29 = tpu.dynamic_rotate %6 by %c121_i32 dim 1 : vector<32x128xf32>, i32 -> vector<32x128xf32>
    %c224 = arith.constant 224 : index
    %c0_11 = arith.constant 0 : index
    %30 = vector.load %arg2[%c224, %c0_11] : memref<512x128xf32, #tpu.memory_space<vmem>>, vector<32x128xf32>
    %31 = arith.mulf %29, %30 : vector<32x128xf32>
    %32 = arith.addf %28, %31 : vector<32x128xf32>
    %c120_i32 = arith.constant 120 : i32
    %33 = tpu.dynamic_rotate %6 by %c120_i32 dim 1 : vector<32x128xf32>, i32 -> vector<32x128xf32>
    %c256 = arith.constant 256 : index
    %c0_12 = arith.constant 0 : index
    %34 = vector.load %arg2[%c256, %c0_12] : memref<512x128xf32, #tpu.memory_space<vmem>>, vector<32x128xf32>
    %35 = arith.mulf %33, %34 : vector<32x128xf32>
    %36 = arith.addf %32, %35 : vector<32x128xf32>
    %c119_i32 = arith.constant 119 : i32
    %37 = tpu.dynamic_rotate %6 by %c119_i32 dim 1 : vector<32x128xf32>, i32 -> vector<32x128xf32>
    %c288 = arith.constant 288 : index
    %c0_13 = arith.constant 0 : index
    %38 = vector.load %arg2[%c288, %c0_13] : memref<512x128xf32, #tpu.memory_space<vmem>>, vector<32x128xf32>
    %39 = arith.mulf %37, %38 : vector<32x128xf32>
    %40 = arith.addf %36, %39 : vector<32x128xf32>
    %c352 = arith.constant 352 : index
    %c0_14 = arith.constant 0 : index
    %41 = vector.load %arg2[%c352, %c0_14] : memref<512x128xf32, #tpu.memory_space<vmem>>, vector<32x128xf32>
    %42 = arith.addf %40, %41 : vector<32x128xf32>
    %cst_15 = arith.constant 0.000000e+00 : f32
    %43 = vector.broadcast %cst_15 : f32 to vector<32x128xf32>
    %44 = arith.maximumf %42, %43 : vector<32x128xf32>
    %c0_16 = arith.constant 0 : index
    %c0_17 = arith.constant 0 : index
    %45 = vector.load %arg3[%c0_16, %c0_17] : memref<128x32xf32, #tpu.memory_space<vmem>>, vector<128x32xf32>
    %cst_18 = arith.constant dense<0.000000e+00> : vector<128x128xf32>
    %46 = tpu.matmul %45, %44, %cst_18 {dimension_numbers = #tpu.dot_dimension_numbers<[1], [0], [0], [1], [0, 0, 1, 1], [], []>} : vector<128x32xf32>, vector<32x128xf32>, vector<128x128xf32> -> vector<128x128xf32>
    %c384 = arith.constant 384 : index
    %c0_19 = arith.constant 0 : index
    %47 = vector.load %arg2[%c384, %c0_19] : memref<512x128xf32, #tpu.memory_space<vmem>>, vector<128x128xf32>
    %48 = arith.addf %46, %47 : vector<128x128xf32>
    %c0_20 = arith.constant 0 : index
    %c0_21 = arith.constant 0 : index
    %49 = vector.load %arg1[%c0_20, %c0_21] : memref<128x128xf32, #tpu.memory_space<vmem>>, vector<128x128xf32>
    %50 = arith.addf %48, %49 : vector<128x128xf32>
    %cst_22 = arith.constant 0.000000e+00 : f32
    %51 = vector.broadcast %cst_22 : f32 to vector<128x128xf32>
    %52 = arith.maximumf %50, %51 : vector<128x128xf32>
    %c0_23 = arith.constant 0 : index
    %c0_24 = arith.constant 0 : index
    %53 = vector.load %arg4[%c0_23, %c0_24] : memref<128x128xf32, #tpu.memory_space<vmem>>, vector<128x128xf32>
    tpu.vector_store %arg4[%c0_23, %c0_24], %52 {strides = array<i32>} : memref<128x128xf32, #tpu.memory_space<vmem>>, vector<128x128xf32>,
    return
  }
  func.func @transform_0(%arg0: i32) -> (i32, i32) {
    %c0_i32 = arith.constant 0 : i32
    %c0_i32_0 = arith.constant 0 : i32
    return %c0_i32, %arg0 : i32, i32
  }
  func.func @transform_1(%arg0: i32) -> (i32, i32) {
    %c0_i32 = arith.constant 0 : i32
    %c0_i32_0 = arith.constant 0 : i32
    %c0_i32_1 = arith.constant 0 : i32
    return %c0_i32, %c0_i32_0 : i32, i32
  }
  func.func @transform_2(%arg0: i32) -> (i32, i32) {
    %c0_i32 = arith.constant 0 : i32
    %c0_i32_0 = arith.constant 0 : i32
    %c0_i32_1 = arith.constant 0 : i32
    return %c0_i32, %c0_i32_0 : i32, i32
  }
  func.func @transform_3(%arg0: i32) -> (i32, i32) {
    %c0_i32 = arith.constant 0 : i32
    %c0_i32_0 = arith.constant 0 : i32
    return %c0_i32, %arg0 : i32, i32
  }
}

</mosaic_0001>

<bundles_post_ra>
// kernel: tpu_custom_call.1
= control target key start
LH: loop header
LB: loop body
LE: loop exit
PB: predicated region body
PF: predicated region fallthrough
CT: control target
= control target key end

     0   :  { %8 = vsyncpa [#allocation3], 0  ;;  %s1096_s0 = inlined_call_operand.vmem [shape: f32[128,128], index: 0, kind: input, shape index: {}]   ;;  %s1097_s1 = inlined_call_operand.hbm [shape: f32[512,128], index: 1, kind: input, shape index: {}]   ;;  %s1098_s2 = inlined_call_operand.vmem [shape: f32[128,32], index: 2, kind: input, shape index: {}]   ;;  %s1099_s3 = inlined_call_operand.hbm [shape: f32[128,128], index: 3, kind: output, shape index: {}]  }
   0x1   :  { %9 = vsyncpa [#allocation4], 0  ;;  %s794_s12 = smov [#allocation2]  }
   0x2   :  { %s17_s13 = sshll.u32 %s794_s12, 4  ;;  %s18_s13 = int_to_ptr.vmem [resolvable:$true] %s17_s13 }
   0x3   :  { %s758_s14 = scalar_lea.vmem %s18_s13, 8192  ;;  %p763_p1 = scmp.lt.s32.totalorder %s18_s13, %s18_s13 }
   0x4   :  { %p759_p0 = scmp.ne.s32.totalorder %s18_s13, %s758_s14  ;;  %p764_p2 = scmp.lt.s32.totalorder %s758_s14, %s758_s14 }
   0x6   :  { %p765_p3 = por %p764_p2, %p763_p1 }
   0x8   :  { %p766_p4 = pnand %p765_p3, %p759_p0 }
   0xa   :  { %769 = shalt.err (!%p766_p4)
}
   0xb   :  { %s795_s15 = smov 128   ;;  %s796_s16 = smov 8  }
   0xc   :  { %23 = dma.hbm_to_vmem [thread:$0]  %s1097_s1, 8192, %s18_s13, [#allocation3], %s795_s15, %s795_s15, %s796_s16  }
   0xd   :  { %790 = dma.done.wait [#allocation3], 8192  }
   0xe   :  { %791 = vsyncadd [#allocation3], 4294959104  ;;  %v834_v0 = vld [vmem:[%s1096_s0 + $0x78] sm:$0xff]  ;;  %v839_v1 = vld [vmem:[%s1096_s0 + $0x70] sm:$0xff]  ;;  %s798_s1 = smov 7   ;;  %s799_s25 = smov 1  }
   0xf   :  { %1106 = vst [vmem:[#allocation8_spill] sm:$0xff] %v834_v0  ;;  %1107 = vst [vmem:[#allocation9_spill] sm:$0xff] %v839_v1  ;;  %669 = vmatprep.subr.mxu0 %v834_v0  ;;  %v846_v2 = vld [vmem:[%s1096_s0 + $0x68] sm:$0xff]  ;;  %v853_v3 = vld [vmem:[%s1096_s0 + $0x60] sm:$0xff]  ;;  %s800_s26 = smov 127   ;;  %s801_s27 = smov 121  }
  0x10   :  { %670 = vmatpush3.msra.mxu0 %v834_v0  ;;  %1108 = vst [vmem:[#allocation10_spill] sm:$0xff] %v846_v2  ;;  %1109 = vst [vmem:[#allocation11_spill] sm:$0xff] %v853_v3  ;;  %v29_v4 = vld [vmem:[#allocation2] sm:$0xff]  ;;  %v860_v5 = vld [vmem:[%s1096_s0 + $0x58] sm:$0xff]  ;;  %s802_s28 = smov 120   ;;  %s803_s29 = smov 119  }
  0x11   :  { %671 = vmatprep.subr.mxu0 %v839_v1  ;;  %1110 = vst [vmem:[#allocation12_spill] sm:$0xff] %v860_v5  ;;  %701 = vmatprep.mubr.f32.mxu0 %v29_v4  ;;  %v867_v6 = vld [vmem:[%s1096_s0 + $0x50] sm:$0xff]  ;;  %v874_v7 = vld [vmem:[%s1096_s0 + $0x48] sm:$0xff]  ;;  %v881_v8 = vld [vmem:[%s1096_s0 + $0x40] sm:$0xff]  ;;  %vm354_vm0 = vcmask 261120  }
  0x12   :  { %672 = vmatpush3.msra.mxu0 %v839_v1  ;;  %1111 = vst [vmem:[#allocation13_spill] sm:$0xff] %v867_v6  ;;  %v888_v9 = vld [vmem:[%s1096_s0 + $0x38] sm:$0xff]  ;;  %v895_v10 = vld [vmem:[%s1096_s0 + $0x30] sm:$0xff]  ;;  %v902_v11 = vld [vmem:[%s1096_s0 + $0x28] sm:$0xff] }
  0x13   :  { %673 = vmatprep.subr.mxu0 %v846_v2  ;;  %v909_v12 = vld [vmem:[%s1096_s0 + $0x20] sm:$0xff]  ;;  %v916_v13 = vld [vmem:[%s1096_s0 + $0x18] sm:$0xff]  ;;  %v923_v14 = vld [vmem:[%s1096_s0 + $0x10] sm:$0xff] }
  0x14   :  { %674 = vmatpush3.msra.mxu0 %v846_v2  ;;  %v930_v15 = vld [vmem:[%s1096_s0 + $0x8] sm:$0xff]  ;;  %v937_v16 = vld [vmem:[%s1096_s0] sm:$0xff]  ;;  %v31_v18 = vld [vmem:[#allocation2 + $0x10] sm:$0xff]  ;;  %s797_s0 = smov 9  }
  0x15   :  { %675 = vmatprep.subr.mxu0 %v853_v3  ;;  %v30_v17 = vld [vmem:[#allocation2 + $0x8] sm:$0xff]  ;;  %v32_v19 = vld [vmem:[#allocation2 + $0x18] sm:$0xff]  ;;  %v49_v22 = vld [vmem:[#allocation2 + $0x140] sm:$0xff] }
  0x16   :  { %676 = vmatpush3.msra.mxu0 %v853_v3  ;;  %v50_v20 = vld [vmem:[#allocation2 + $0x148] sm:$0xff]  ;;  %v52_v28 = vld [vmem:[#allocation2 + $0x158] sm:$0xff]  ;;  %v51_v32 = vld [vmem:[#allocation2 + $0x150] sm:$0xff] }
  0x17   :  { %677 = vmatprep.subr.mxu0 %v860_v5  ;;  %v322_v36 = vld [vmem:[%s1098_s2] sm:$0xff]  ;;  %v161_v53 = vld [vmem:[#allocation2 + $0x38] sm:$0xff]  ;;  %v220_v2 = vld [vmem:[#allocation2 + $0x90] sm:$0xff] }
  0x18   :  { %678 = vmatpush3.msra.mxu0 %v860_v5  ;;  %715 = vmatprep.mubr.msk.f32.mxu1 %vm354_vm0, %v322_v36  ;;  %v145_v55 = vld [vmem:[#allocation2 + $0xb8] sm:$0xff]  ;;  %v200_v36 = vld [vmem:[#allocation2 + $0x70] sm:$0xff] }
  0x19   :  { %679 = vmatprep.subr.mxu0 %v867_v6  ;;  %v181_v58 = vld [vmem:[#allocation2 + $0x58] sm:$0xff] }
  0x1a   :  { %680 = vmatpush3.msra.mxu0 %v867_v6  ;;  %v201_v61 = vld [vmem:[#allocation2 + $0x78] sm:$0xff] }
  0x1b   :  { %681 = vmatprep.subr.mxu0 %v874_v7 }
  0x1c   :  { %682 = vmatpush3.msra.mxu0 %v874_v7 }
  0x1d   :  { %683 = vmatprep.subr.mxu0 %v881_v8 }
  0x1e   :  { %684 = vmatpush3.msra.mxu0 %v881_v8 }
  0x1f   :  { %685 = vmatprep.subr.mxu0 %v888_v9 }
  0x20   :  { %686 = vmatpush3.msra.mxu0 %v888_v9 }
  0x21   :  { %687 = vmatprep.subr.mxu0 %v895_v10 }
  0x22   :  { %688 = vmatpush3.msra.mxu0 %v895_v10 }
  0x23   :  { %689 = vmatprep.subr.mxu0 %v902_v11 }
  0x24   :  { %690 = vmatpush3.msra.mxu0 %v902_v11 }
  0x25   :  { %691 = vmatprep.subr.mxu0 %v909_v12 }
  0x26   :  { %692 = vmatpush3.msra.mxu0 %v909_v12 }
  0x27   :  { %693 = vmatprep.subr.mxu0 %v916_v13 }
  0x28   :  { %694 = vmatpush3.msra.mxu0 %v916_v13 }
  0x29   :  { %695 = vmatprep.subr.mxu0 %v923_v14 }
  0x2a   :  { %696 = vmatpush3.msra.mxu0 %v923_v14 }
  0x2b   :  { %697 = vmatprep.subr.mxu0 %v930_v15 }
  0x2c   :  { %698 = vmatpush3.msra.mxu0 %v930_v15 }
  0x2d   :  { %699 = vmatprep.subr.mxu0 %v937_v16 }
  0x2e   :  { %700 = vmatpush3.msra.mxu0 %v937_v16 }
  0x2f   :  { %702 = vmatmul.mubr.f32.vlgmr.msra.gmra.mxu0 %v30_v17  ;;  %v160_v17 = vld [vmem:[#allocation2 + $0x30] sm:$0xff] }
  0x30   :  { %704 = vmatprep.mubr.f32.mxu0 %v31_v18  ;;  %v221_v18 = vld [vmem:[#allocation2 + $0x98] sm:$0xff] }
  0x33   :  { %705 = vmatmul.mubr.f32.gmra.mxu0 %v32_v19 }
  0xef   :  { %v703_v21 = vpop.f32.mrf.mxu0 }
  0xf0   :  { %v125_v23 = vadd.f32 %v703_v21, %v50_v20  ;;  %v158_v20 = vld [vmem:[#allocation2 + $0x20] sm:$0xff] }
  0xf1   :  { %v119_v24 = vpop.f32.mrf.mxu0 }
  0xf2   :  { %v943_v25 = vmax.f32 %v125_v23, 0.0  ;;  %v120_v26 = vadd.f32 %v119_v24, %v49_v22  ;;  %v144_v22 = vld [vmem:[#allocation2 + $0xb0] sm:$0xff]  ;;  %v241_v24 = vld [vmem:[#allocation2 + $0xd8] sm:$0xff] }
  0xf3   :  { %v706_v29 = vpop.f32.mrf.mxu0  ;;  %v180_v23 = vld [vmem:[#allocation2 + $0x50] sm:$0xff] }
  0xf4   :  { %v945_v27 = vmax.f32 %v120_v26, 0.0  ;;  %152 = vrot.lane.b32.xlu1 %v943_v25, %s797_s0  ;;  %v135_v30 = vadd.f32 %v706_v29, %v52_v28  ;;  %v159_v28 = vld [vmem:[#allocation2 + $0x28] sm:$0xff]  ;;  %v142_v29 = vld [vmem:[#allocation2 + $0xa0] sm:$0xff] }
  0xf5   :  { %v129_v31 = vpop.f32.mrf.mxu0 }
  0xf6   :  { %150 = vrot.lane.b32.xlu0 %v945_v27, %s797_s0  ;;  %v141_v33 = vmax.f32 %v135_v30, 0.0  ;;  %v130_v34 = vadd.f32 %v129_v31, %v51_v32  ;;  %v178_v30 = vld [vmem:[#allocation2 + $0x40] sm:$0xff]  ;;  %v146_v0 = vmul.f32 %v142_v29, %v945_v27 }
  0xf8   :  { %172 = vrot.lane.b32.xlu1 %v943_v25, %s796_s16  ;;  %v962_v35 = vmax.f32 %v130_v34, 0.0  ;;  %v149_v60 = vmul.f32 %v145_v55, %v141_v33  ;;  %v179_v55 = vld [vmem:[#allocation2 + $0x48] sm:$0xff] }
  0xfa   :  { %170 = vrot.lane.b32.xlu0 %v945_v27, %s796_s16 }
  0xfc   :  { %192 = vrot.lane.b32.xlu1 %v943_v25, %s798_s1 }
  0xfe   :  { %190 = vrot.lane.b32.xlu0 %v945_v27, %s798_s1 }
 0x100   :  { %212 = vrot.lane.b32.xlu1 %v943_v25, %s799_s25 }
 0x102   :  { %210 = vrot.lane.b32.xlu0 %v945_v27, %s799_s25 }
 0x104   :  { %232 = vrot.lane.b32.xlu1 %v943_v25, %s800_s26 }
 0x106   :  { %230 = vrot.lane.b32.xlu0 %v945_v27, %s800_s26 }
 0x108   :  { %252 = vrot.lane.b32.xlu1 %v943_v25, %s801_s27 }
 0x10a   :  { %250 = vrot.lane.b32.xlu0 %v945_v27, %s801_s27 }
 0x10c   :  { %272 = vrot.lane.b32.xlu1 %v943_v25, %s802_s28 }
 0x10e   :  { %156 = vrot.lane.b32.xlu0 %v141_v33, %s797_s0 }
 0x110   :  { %176 = vrot.lane.b32.xlu1 %v141_v33, %s796_s16 }
 0x112   :  { %154 = vrot.lane.b32.xlu0 %v962_v35, %s797_s0 }
 0x114   :  { %196 = vrot.lane.b32.xlu1 %v141_v33, %s798_s1 }
 0x116   :  { %174 = vrot.lane.b32.xlu0 %v962_v35, %s796_s16 }
 0x118   :  { %216 = vrot.lane.b32.xlu1 %v141_v33, %s799_s25 }
 0x11a   :  { %194 = vrot.lane.b32.xlu0 %v962_v35, %s798_s1 }
 0x11c   :  { %236 = vrot.lane.b32.xlu1 %v141_v33, %s800_s26 }
 0x11e   :  { %214 = vrot.lane.b32.xlu0 %v962_v35, %s799_s25 }
 0x120   :  { %256 = vrot.lane.b32.xlu1 %v141_v33, %s801_s27 }
 0x122   :  { %234 = vrot.lane.b32.xlu0 %v962_v35, %s800_s26 }
 0x124   :  { %276 = vrot.lane.b32.xlu1 %v141_v33, %s802_s28 }
 0x126   :  { %254 = vrot.lane.b32.xlu0 %v962_v35, %s801_s27 }
 0x128   :  { %296 = vrot.lane.b32.xlu1 %v141_v33, %s803_s29 }
 0x12a   :  { %274 = vrot.lane.b32.xlu0 %v962_v35, %s802_s28 }
 0x12c   :  { %270 = vrot.lane.b32.xlu1 %v945_v27, %s802_s28 }
 0x12e   :  { %294 = vrot.lane.b32.xlu0 %v962_v35, %s803_s29 }
 0x130   :  { %290 = vrot.lane.b32.xlu1 %v945_v27, %s803_s29  ;;  %v219_v27 = vld [vmem:[#allocation2 + $0x88] sm:$0xff] }
 0x132   :  { %292 = vrot.lane.b32.xlu0 %v943_v25, %s803_s29 }
 0x166   :  { %v153_v37 = vpop.permute.xlu1 %152 }
 0x167   :  { %v163_v1 = vmul.f32 %v159_v28, %v153_v37  ;;  %v240_v37 = vld [vmem:[#allocation2 + $0xd0] sm:$0xff] }
 0x168   :  { %v151_v38 = vpop.permute.xlu0 %150 }
 0x169   :  { %v162_v33 = vmul.f32 %v158_v20, %v151_v38  ;;  %v218_v38 = vld [vmem:[#allocation2 + $0x80] sm:$0xff] }
 0x16a   :  { %v981_v39 = vpop.permute.xlu1 %172 }
 0x16b   :  { %v166_v5 = vadd.f32 %v162_v33, %v146_v0 }
 0x16c   :  { %v171_v40 = vpop.permute.xlu0 %170 }
 0x16d   :  { %v182_v3 = vmul.f32 %v178_v30, %v171_v40  ;;  %v238_v40 = vld [vmem:[#allocation2 + $0xc0] sm:$0xff] }
 0x16e   :  { %v983_v41 = vpop.permute.xlu1 %192 }
 0x16f   :  { %v186_v29 = vadd.f32 %v182_v3, %v166_v5  ;;  %v280_v3 = vld [vmem:[#allocation2 + $0x110] sm:$0xff] }
 0x170   :  { %v985_v42 = vpop.permute.xlu0 %190 }
 0x172   :  { %v987_v43 = vpop.permute.xlu1 %212 }
 0x174   :  { %v989_v44 = vpop.permute.xlu0 %210 }
 0x175   :  { %v222_v30 = vmul.f32 %v218_v38, %v989_v44  ;;  %v279_v38 = vld [vmem:[#allocation2 + $0x108] sm:$0xff] }
 0x176   :  { %v991_v45 = vpop.permute.xlu1 %232 }
 0x178   :  { %v993_v46 = vpop.permute.xlu0 %230 }
 0x17a   :  { %v995_v47 = vpop.permute.xlu1 %252 }
 0x17c   :  { %v997_v48 = vpop.permute.xlu0 %250 }
 0x17e   :  { %v999_v49 = vpop.permute.xlu1 %272 }
 0x180   :  { %v157_v50 = vpop.permute.xlu0 %156 }
 0x181   :  { %v165_v57 = vmul.f32 %v161_v53, %v157_v50  ;;  %v261_v50 = vld [vmem:[#allocation2 + $0xf8] sm:$0xff] }
 0x182   :  { %v177_v51 = vpop.permute.xlu1 %176 }
 0x183   :  { %v169_v63 = vadd.f32 %v165_v57, %v149_v60  ;;  %v185_v4 = vmul.f32 %v181_v58, %v177_v51  ;;  %v143_v51 = vld [vmem:[#allocation2 + $0xa8] sm:$0xff]  ;;  %v198_v57 = vld [vmem:[#allocation2 + $0x60] sm:$0xff]  ;;  %v148_v58 = vmul.f32 %v144_v22, %v962_v35  ;;  %v183_v35 = vmul.f32 %v179_v55, %v981_v39 }
 0x184   :  { %v155_v52 = vpop.permute.xlu0 %154  ;;  %v147_v6 = vmul.f32 %v143_v51, %v943_v25  ;;  %v260_v25 = vld [vmem:[#allocation2 + $0xf0] sm:$0xff]  ;;  %v239_v39 = vld [vmem:[#allocation2 + $0xc8] sm:$0xff] }
 0x185   :  { %v189_v31 = vadd.f32 %v185_v4, %v169_v63  ;;  %v164_v32 = vmul.f32 %v160_v17, %v155_v52  ;;  %v281_v52 = vld [vmem:[#allocation2 + $0x118] sm:$0xff]  ;;  %v243_v55 = vmul.f32 %v239_v39, %v991_v45 }
 0x186   :  { %v197_v54 = vpop.permute.xlu1 %196  ;;  %v167_v28 = vadd.f32 %v163_v1, %v147_v6 }
 0x187   :  { %v205_v21 = vmul.f32 %v201_v61, %v197_v54  ;;  %v168_v4 = vadd.f32 %v164_v32, %v148_v58  ;;  %v258_v32 = vld [vmem:[#allocation2 + $0xe0] sm:$0xff] }
 0x188   :  { %v175_v56 = vpop.permute.xlu0 %174  ;;  %v262_v58 = vmul.f32 %v258_v32, %v997_v48  ;;  %v298_v48 = vld [vmem:[#allocation2 + $0x120] sm:$0xff] }
 0x189   :  { %v209_v54 = vadd.f32 %v205_v21, %v189_v31  ;;  %v184_v60 = vmul.f32 %v180_v23, %v175_v56  ;;  %v202_v56 = vmul.f32 %v198_v57, %v985_v42  ;;  %v301_v31 = vld [vmem:[#allocation2 + $0x138] sm:$0xff]  ;;  %v259_v57 = vld [vmem:[#allocation2 + $0xe8] sm:$0xff] }
 0x18a   :  { %v217_v59 = vpop.permute.xlu1 %216 }
 0x18b   :  { %v225_v34 = vmul.f32 %v221_v18, %v217_v59  ;;  %v199_v59 = vld [vmem:[#allocation2 + $0x68] sm:$0xff]  ;;  %v188_v21 = vadd.f32 %v184_v60, %v168_v4  ;;  %v278_v60 = vld [vmem:[#allocation2 + $0x100] sm:$0xff] }
 0x18c   :  { %v195_v62 = vpop.permute.xlu0 %194 }
 0x18d   :  { %v229_v17 = vadd.f32 %v225_v34, %v209_v54  ;;  %v204_v18 = vmul.f32 %v200_v36, %v195_v62  ;;  %v203_v62 = vmul.f32 %v199_v59, %v983_v41  ;;  %v187_v36 = vadd.f32 %v183_v35, %v167_v28  ;;  %v312_v28 = vld [vmem:[#allocation2 + $0x170] sm:$0xff] }
 0x18e   :  { %v237_v19 = vpop.permute.xlu1 %236 }
 0x18f   :  { %v245_v61 = vmul.f32 %v241_v24, %v237_v19  ;;  %v208_v42 = vadd.f32 %v204_v18, %v188_v21  ;;  %v263_v18 = vmul.f32 %v259_v57, %v995_v47  ;;  %v332_v57 = vld [vmem:[%s1098_s2 + $0x50] sm:$0xff] }
 0x190   :  { %v215_v26 = vpop.permute.xlu0 %214 }
 0x191   :  { %v249_v22 = vadd.f32 %v245_v61, %v229_v17  ;;  %v224_v23 = vmul.f32 %v220_v2, %v215_v26  ;;  %v242_v2 = vmul.f32 %v238_v40, %v993_v46  ;;  %v207_v26 = vadd.f32 %v203_v62, %v187_v36  ;;  %v313_v61 = vld [vmem:[#allocation2 + $0x178] sm:$0xff]  ;;  %v300_v17 = vld [vmem:[#allocation2 + $0x130] sm:$0xff] }
 0x192   :  { %v257_v53 = vpop.permute.xlu1 %256 }
 0x193   :  { %v265_v20 = vmul.f32 %v261_v50, %v257_v53  ;;  %v206_v50 = vadd.f32 %v202_v56, %v186_v29  ;;  %v223_v53 = vmul.f32 %v219_v27, %v987_v43  ;;  %v228_v5 = vadd.f32 %v224_v23, %v208_v42  ;;  %v311_v42 = vld [vmem:[#allocation2 + $0x168] sm:$0xff] }
 0x194   :  { %v235_v63 = vpop.permute.xlu0 %234  ;;  %v283_v27 = vmul.f32 %v279_v38, %v999_v49 }
 0x195   :  { %v269_v34 = vadd.f32 %v265_v20, %v249_v22  ;;  %v244_v33 = vmul.f32 %v240_v37, %v235_v63  ;;  %v226_v51 = vadd.f32 %v222_v30, %v206_v50  ;;  %v227_v46 = vadd.f32 %v223_v53, %v207_v26  ;;  %v329_v26 = vld [vmem:[%s1098_s2 + $0x38] sm:$0xff] }
 0x196   :  { %v277_v19 = vpop.permute.xlu1 %276 }
 0x197   :  { %v285_v24 = vmul.f32 %v281_v52, %v277_v19  ;;  %v248_v63 = vadd.f32 %v244_v33, %v228_v5  ;;  %v246_v59 = vadd.f32 %v242_v2, %v226_v51  ;;  %v247_v45 = vadd.f32 %v243_v55, %v227_v46  ;;  %v325_v5 = vld [vmem:[%s1098_s2 + $0x18] sm:$0xff]  ;;  %v330_v51 = vld [vmem:[%s1098_s2 + $0x40] sm:$0xff]  ;;  %v331_v55 = vld [vmem:[%s1098_s2 + $0x48] sm:$0xff] }
 0x198   :  { %v255_v0 = vpop.permute.xlu0 %254  ;;  %v338_v46 = vld [vmem:[#allocation2 + $0x180] sm:$0xff] }
 0x199   :  { %v289_v6 = vadd.f32 %v285_v24, %v269_v34  ;;  %v264_v41 = vmul.f32 %v260_v25, %v255_v0  ;;  %v266_v37 = vadd.f32 %v262_v58, %v246_v59  ;;  %v299_v24 = vld [vmem:[#allocation2 + $0x128] sm:$0xff]  ;;  %v267_v29 = vadd.f32 %v263_v18, %v247_v45  ;;  %v310_v34 = vld [vmem:[#allocation2 + $0x160] sm:$0xff]  ;;  %v333_v58 = vld [vmem:[%s1098_s2 + $0x58] sm:$0xff] }
 0x19a   :  { %v297_v1 = vpop.permute.xlu1 %296 }
 0x19b   :  { %v305_v44 = vmul.f32 %v301_v31, %v297_v1  ;;  %v268_v20 = vadd.f32 %v264_v41, %v248_v63  ;;  %v287_v0 = vadd.f32 %v283_v27, %v267_v29  ;;  %v323_v1 = vld [vmem:[%s1098_s2 + $0x8] sm:$0xff]  ;;  %v337_v63 = vld [vmem:[%s1098_s2 + $0x78] sm:$0xff] }
 0x19c   :  { %v275_v54 = vpop.permute.xlu0 %274  ;;  %v327_v41 = vld [vmem:[%s1098_s2 + $0x28] sm:$0xff] }
 0x19d   :  { %v309_v43 = vadd.f32 %v305_v44, %v289_v6  ;;  %v284_v52 = vmul.f32 %v280_v3, %v275_v54  ;;  %v324_v3 = vld [vmem:[%s1098_s2 + $0x10] sm:$0xff]  ;;  %v326_v6 = vld [vmem:[%s1098_s2 + $0x20] sm:$0xff] }
 0x19e   :  { %v271_v4 = vpop.permute.xlu1 %270  ;;  %v328_v44 = vld [vmem:[%s1098_s2 + $0x30] sm:$0xff]  ;;  %v334_v54 = vld [vmem:[%s1098_s2 + $0x60] sm:$0xff] }
 0x19f   :  { %v282_v35 = vmul.f32 %v278_v60, %v271_v4  ;;  %v317_v56 = vadd.f32 %v313_v61, %v309_v43  ;;  %v288_v40 = vadd.f32 %v284_v52, %v268_v20  ;;  %v335_v60 = vld [vmem:[%s1098_s2 + $0x68] sm:$0xff]  ;;  %v336_v61 = vld [vmem:[%s1098_s2 + $0x70] sm:$0xff]  ;;  %v341_v4 = vld [vmem:[#allocation2 + $0x198] sm:$0xff]  ;;  %s804_s2 = smov [#allocation5]  }
 0x1a0   :  { %v295_v19 = vpop.permute.xlu0 %294  ;;  %v339_v43 = vld [vmem:[#allocation2 + $0x188] sm:$0xff]  ;;  %s601_s8 = sshll.u32 %s804_s2, 4  ;;  %s602_s8 = int_to_ptr.vmem [resolvable:$true] %s601_s8 }
 0x1a1   :  { %v304_v21 = vmul.f32 %v300_v17, %v295_v19  ;;  %v321_v22 = vmax.f32 %v317_v56, 0.0  ;;  %v286_v62 = vadd.f32 %v282_v35, %v266_v37  ;;  %v340_v35 = vld [vmem:[#allocation2 + $0x190] sm:$0xff]  ;;  %s770_s9 = scalar_lea.vmem %s602_s8, 2048  ;;  %p775_p6 = scmp.lt.s32.totalorder %s602_s8, %s602_s8 }
 0x1a2   :  { %v291_v23 = vpop.permute.xlu1 %290  ;;  %p771_p5 = scmp.ne.s32.totalorder %s602_s8, %s770_s9  ;;  %p776_p7 = scmp.lt.s32.totalorder %s770_s9, %s770_s9 }
 0x1a3   :  { %v308_v30 = vadd.f32 %v304_v21, %v288_v40  ;;  %v302_v25 = vmul.f32 %v298_v48, %v291_v23  ;;  %707 = vmatprep.subr.mxu1 %v321_v22  ;;  %v343_v48 = vld [vmem:[#allocation2 + $0x1a8] sm:$0xff]  ;;  %v342_v23 = vld [vmem:[#allocation2 + $0x1a0] sm:$0xff] }
 0x1a4   :  { %708 = vmatpush3.msra.mxu1 %v321_v22  ;;  %v293_v47 = vpop.permute.xlu0 %292  ;;  %p777_p8 = por %p776_p7, %p775_p6 }
 0x1a5   :  { %v306_v31 = vadd.f32 %v302_v25, %v286_v62  ;;  %v303_v39 = vmul.f32 %v299_v24, %v293_v47  ;;  %v316_v32 = vadd.f32 %v312_v28, %v308_v30  ;;  %v345_v62 = vld [vmem:[#allocation2 + $0x1b8] sm:$0xff] }
 0x1a6   :  { %p778_p9 = pnand %p777_p8, %p771_p5 }
 0x1a7   :  { %v307_v49 = vadd.f32 %v303_v39, %v287_v0  ;;  %v320_v33 = vmax.f32 %v316_v32, 0.0  ;;  %v314_v50 = vadd.f32 %v310_v34, %v306_v31  ;;  %v344_v0 = vld [vmem:[#allocation2 + $0x1b0] sm:$0xff] }
 0x1a9   :  { %709 = vmatprep.subr.mxu1 %v320_v33  ;;  %v315_v36 = vadd.f32 %v311_v42, %v307_v49  ;;  %v318_v2 = vmax.f32 %v314_v50, 0.0  ;;  %v347_v42 = vld [vmem:[#allocation2 + $0x1c8] sm:$0xff] }
 0x1aa   :  { %710 = vmatpush3.msra.mxu1 %v320_v33 }
 0x1ab   :  { %v319_v53 = vmax.f32 %v315_v36, 0.0  ;;  %v346_v36 = vld [vmem:[#allocation2 + $0x1c0] sm:$0xff] }
 0x1ad   :  { %711 = vmatprep.subr.mxu1 %v319_v53 }
 0x1ae   :  { %712 = vmatpush3.msra.mxu1 %v319_v53 }
 0x1af   :  { %713 = vmatprep.subr.mxu1 %v318_v2 }
 0x1b0   :  { %714 = vmatpush3.msra.mxu1 %v318_v2 }
 0x1b1   :  { %716 = vmatmul.mubr.msk.f32.vlgmr.msra.gmra.mxu1 %vm354_vm0, %v323_v1  ;;  %v349_v1 = vld [vmem:[#allocation2 + $0x1d8] sm:$0xff] }
 0x1b2   :  { %718 = vmatprep.mubr.msk.f32.mxu1 %vm354_vm0, %v324_v3 }
 0x1b5   :  { %719 = vmatmul.mubr.msk.f32.gmra.mxu1 %vm354_vm0, %v325_v5 }
 0x1b6   :  { %721 = vmatprep.mubr.msk.f32.mxu1 %vm354_vm0, %v326_v6 }
 0x1b9   :  { %722 = vmatmul.mubr.msk.f32.gmra.mxu1 %vm354_vm0, %v327_v41  ;;  %v348_v41 = vld [vmem:[#allocation2 + $0x1d0] sm:$0xff] }
 0x1ba   :  { %724 = vmatprep.mubr.msk.f32.mxu1 %vm354_vm0, %v328_v44 }
 0x1bd   :  { %725 = vmatmul.mubr.msk.f32.gmra.mxu1 %vm354_vm0, %v329_v26 }
 0x1be   :  { %727 = vmatprep.mubr.msk.f32.mxu1 %vm354_vm0, %v330_v51 }
 0x1c1   :  { %728 = vmatmul.mubr.msk.f32.gmra.mxu1 %vm354_vm0, %v331_v55  ;;  %v351_v55 = vld [vmem:[#allocation2 + $0x1e8] sm:$0xff] }
 0x1c2   :  { %730 = vmatprep.mubr.msk.f32.mxu1 %vm354_vm0, %v332_v57 }
 0x1c5   :  { %731 = vmatmul.mubr.msk.f32.gmra.mxu1 %vm354_vm0, %v333_v58 }
 0x1c6   :  { %733 = vmatprep.mubr.msk.f32.mxu1 %vm354_vm0, %v334_v54 }
 0x1c9   :  { %734 = vmatmul.mubr.msk.f32.gmra.mxu1 %vm354_vm0, %v335_v60 }
 0x1ca   :  { %736 = vmatprep.mubr.msk.f32.mxu1 %vm354_vm0, %v336_v61  ;;  %v350_v61 = vld [vmem:[#allocation2 + $0x1e0] sm:$0xff] }
 0x1cd   :  { %737 = vmatmul.mubr.msk.f32.gmra.mxu1 %vm354_vm0, %v337_v63 }
 0x271   :  { %v717_v52 = vpop.f32.mrf.mxu1 }
 0x272   :  { %v475_v59 = vadd.f32 %v717_v52, %v339_v43 }
 0x273   :  { %v469_v38 = vpop.f32.mrf.mxu1 }
 0x274   :  { %v549_v17 = vadd.f32 %v475_v59, %v930_v15  ;;  %v470_v18 = vadd.f32 %v469_v38, %v338_v46  ;;  %v353_v59 = vld [vmem:[#allocation2 + $0x1f8] sm:$0xff] }
 0x275   :  { %v720_v20 = vpop.f32.mrf.mxu1 }
 0x276   :  { %v565_v56 = vmax.f32 %v549_v17, 0.0  ;;  %v548_v45 = vadd.f32 %v470_v18, %v937_v16  ;;  %v485_v37 = vadd.f32 %v720_v20, %v341_v4  ;;  %v352_v20 = vld [vmem:[#allocation2 + $0x1f0] sm:$0xff] }
 0x277   :  { %v479_v19 = vpop.f32.mrf.mxu1 }
 0x278   :  { %581 = vst [vmem:[#allocation5 + $0x8] sm:$0xff] %v565_v56  ;;  %v564_v27 = vmax.f32 %v548_v45, 0.0  ;;  %v551_v40 = vadd.f32 %v485_v37, %v916_v13  ;;  %v480_v21 = vadd.f32 %v479_v19, %v340_v35  ;;  %v1115_v56 = vld [vmem:[#allocation11_spill] sm:$0xff] }
 0x279   :  { %v723_v22 = vpop.f32.mrf.mxu1 }
 0x27a   :  { %580 = vst [vmem:[#allocation5] sm:$0xff] %v564_v27  ;;  %v567_v24 = vmax.f32 %v551_v40, 0.0  ;;  %v550_v15 = vadd.f32 %v480_v21, %v923_v14  ;;  %v495_v28 = vadd.f32 %v723_v22, %v343_v48  ;;  %v1116_v27 = vld [vmem:[#allocation8_spill] sm:$0xff] }
 0x27b   :  { %v489_v29 = vpop.f32.mrf.mxu1 }
 0x27c   :  { %583 = vst [vmem:[#allocation5 + $0x18] sm:$0xff] %v567_v24  ;;  %v566_v30 = vmax.f32 %v550_v15, 0.0  ;;  %v553_v16 = vadd.f32 %v495_v28, %v902_v11  ;;  %v490_v25 = vadd.f32 %v489_v29, %v342_v23  ;;  %v1117_v23 = vld [vmem:[#allocation9_spill] sm:$0xff] }
 0x27d   :  { %v726_v47 = vpop.f32.mrf.mxu1 }
 0x27e   :  { %582 = vst [vmem:[#allocation5 + $0x10] sm:$0xff] %v566_v30  ;;  %v569_v31 = vmax.f32 %v553_v16, 0.0  ;;  %v552_v13 = vadd.f32 %v490_v25, %v909_v12  ;;  %v505_v39 = vadd.f32 %v726_v47, %v345_v62 }
 0x27f   :  { %v499_v32 = vpop.f32.mrf.mxu1 }
 0x280   :  { %585 = vst [vmem:[#allocation5 + $0x28] sm:$0xff] %v569_v31  ;;  %v568_v34 = vmax.f32 %v552_v13, 0.0  ;;  %v555_v14 = vadd.f32 %v505_v39, %v888_v9  ;;  %v500_v49 = vadd.f32 %v499_v32, %v344_v0 }
 0x281   :  { %v729_v33 = vpop.f32.mrf.mxu1 }
 0x282   :  { %584 = vst [vmem:[#allocation5 + $0x20] sm:$0xff] %v568_v34  ;;  %v571_v50 = vmax.f32 %v555_v14, 0.0  ;;  %v554_v11 = vadd.f32 %v500_v49, %v895_v10  ;;  %v515_v53 = vadd.f32 %v729_v33, %v347_v42  ;;  %v1112_v10 = vld [vmem:[#allocation12_spill] sm:$0xff] }
 0x283   :  { %v509_v2 = vpop.f32.mrf.mxu1 }
 0x284   :  { %587 = vst [vmem:[#allocation5 + $0x38] sm:$0xff] %v571_v50  ;;  %v570_v3 = vmax.f32 %v554_v11, 0.0  ;;  %v557_v12 = vadd.f32 %v515_v53, %v874_v7  ;;  %v510_v5 = vadd.f32 %v509_v2, %v346_v36  ;;  %v1113_v7 = vld [vmem:[#allocation13_spill] sm:$0xff] }
 0x285   :  { %v732_v6 = vpop.f32.mrf.mxu1 }
 0x286   :  { %586 = vst [vmem:[#allocation5 + $0x30] sm:$0xff] %v570_v3  ;;  %v573_v44 = vmax.f32 %v557_v12, 0.0  ;;  %v556_v9 = vadd.f32 %v510_v5, %v881_v8  ;;  %v525_v26 = vadd.f32 %v732_v6, %v349_v1  ;;  %v1114_v8 = vld [vmem:[#allocation10_spill] sm:$0xff] }
 0x287   :  { %v519_v51 = vpop.f32.mrf.mxu1 }
 0x288   :  { %589 = vst [vmem:[#allocation5 + $0x48] sm:$0xff] %v573_v44  ;;  %v572_v57 = vmax.f32 %v556_v9, 0.0  ;;  %v559_v58 = vadd.f32 %v525_v26, %v1112_v10  ;;  %v520_v54 = vadd.f32 %v519_v51, %v348_v41 }
 0x289   :  { %v735_v60 = vpop.f32.mrf.mxu1 }
 0x28a   :  { %588 = vst [vmem:[#allocation5 + $0x40] sm:$0xff] %v572_v57  ;;  %v575_v63 = vmax.f32 %v559_v58, 0.0  ;;  %v558_v43 = vadd.f32 %v520_v54, %v1113_v7  ;;  %v535_v52 = vadd.f32 %v735_v60, %v351_v55 }
 0x28b   :  { %v529_v46 = vpop.f32.mrf.mxu1 }
 0x28c   :  { %591 = vst [vmem:[#allocation5 + $0x58] sm:$0xff] %v575_v63  ;;  %v574_v38 = vmax.f32 %v558_v43, 0.0  ;;  %v561_v4 = vadd.f32 %v535_v52, %v1114_v8  ;;  %v530_v17 = vadd.f32 %v529_v46, %v350_v61 }
 0x28d   :  { %v738_v18 = vpop.f32.mrf.mxu1 }
 0x28e   :  { %590 = vst [vmem:[#allocation5 + $0x50] sm:$0xff] %v574_v38  ;;  %v577_v35 = vmax.f32 %v561_v4, 0.0  ;;  %v560_v45 = vadd.f32 %v530_v17, %v1115_v56  ;;  %v545_v37 = vadd.f32 %v738_v18, %v353_v59 }
 0x28f   :  { %v539_v19 = vpop.f32.mrf.mxu1 }
 0x290   :  { %593 = vst [vmem:[#allocation5 + $0x68] sm:$0xff] %v577_v35  ;;  %v576_v48 = vmax.f32 %v560_v45, 0.0  ;;  %v563_v40 = vadd.f32 %v545_v37, %v1116_v27  ;;  %v540_v21 = vadd.f32 %v539_v19, %v352_v20 }
 0x292   :  { %592 = vst [vmem:[#allocation5 + $0x60] sm:$0xff] %v576_v48  ;;  %v579_v22 = vmax.f32 %v563_v40, 0.0  ;;  %v562_v24 = vadd.f32 %v540_v21, %v1117_v23 }
 0x294   :  { %595 = vst [vmem:[#allocation5 + $0x78] sm:$0xff] %v579_v22  ;;  %v578_v15 = vmax.f32 %v562_v24, 0.0 }
 0x296   :  { %594 = vst [vmem:[#allocation5 + $0x70] sm:$0xff] %v578_v15 }
 0x297   :  { %781 = shalt.err (!%p778_p9)
}
 0x298   :  { %607 = dma.vmem_to_hbm [thread:$0]  %s602_s8, 2048, %s1099_s3, [#allocation4], %s795_s15, %s795_s15, %s796_s16  }
 0x299   :  { %792 = dma.done.wait [#allocation4], 2048  }
 0x29a   :  { %793 = vsyncadd [#allocation4], 4294965248 }
 0x29b   :  { %611 = vsyncpa [#allocation3], 1 }
 0x29c   :  { %612 = vsyncpa [#allocation4], 1 }

</bundles_post_ra>
